<compile_context>
chip_gen: v7x
topology: tpu7x:2x2x1
jax: 0.10.0
libtpu: 0.0.40
codegen_flags: <defaults>
</compile_context>

<pallas_src>
import functools

import jax
import jax.numpy as jnp
from jax.experimental import pallas as pl
from jax.experimental.pallas import tpu as pltpu


def _round_up(x, m):
    return ((x + m - 1) // m) * m


def _vmem_capacity_bytes():
    """Per-core VMEM capacity; conservative (v7x) default if the query fails."""
    try:
        return int(pltpu.get_tpu_info().vmem_capacity_bytes)
    except Exception:
        return 64 << 20


# ---------------------------------------------------------------------------
# Fully fused path: every layer's weights resident in VMEM, grid over row
# tiles only, intermediate activations never touch HBM.
# ---------------------------------------------------------------------------

def _fused_mlp_kernel(*refs, num_layers):
    # refs = [x_ref, w0, b0, w1, b1, ..., w_{L-1}, b_{L-1}, o_ref]
    x_ref, o_ref = refs[0], refs[-1]
    params = refs[1:-1]

    h = x_ref[...]                                     # (tm, K) f32 row tile
    for layer in range(num_layers):
        w_ref = params[2 * layer]                      # (Kin, Kout) bf16, resident
        b_ref = params[2 * layer + 1]                  # (1, Kout)  f32, resident
        # bf16 x bf16 operands, f32 accumulation on the MXU.
        h = jnp.dot(h.astype(jnp.bfloat16), w_ref[...],
                    preferred_element_type=jnp.float32)
        h = h + b_ref[...]                             # f32 VPU (broadcast rows)
        if layer < num_layers - 1:
            h = jnp.maximum(h, 0.0)                    # ReLU, f32 VPU
    o_ref[...] = h.astype(o_ref.dtype)


def _fused_vmem_estimate(tm, k_in, padded_params, weight_buffers=1):
    wb = sum(int(w.size) * w.dtype.itemsize * weight_buffers
             for (w, _) in padded_params)
    bb = sum(int(b.size) * b.dtype.itemsize * weight_buffers
             for (_, b) in padded_params)
    n_out = padded_params[-1][0].shape[1]
    widest = max([k_in] + [w.shape[1] for (w, _) in padded_params])
    io = 2 * tm * k_in * 4 + 2 * tm * n_out * 4        # double-buffered x / out tiles
    act = 3 * tm * widest * 4                          # f32 intermediates + bf16 copies
    return wb + bb + io + act


def _fused_cost(m, k_in, padded_params):
    flops = 2 * m * sum(w.shape[0] * w.shape[1] for (w, _) in padded_params)
    n_out = padded_params[-1][0].shape[1]
    byts = (m * k_in * 4 + m * n_out * 4
            + sum(int(w.size) * 2 + int(b.size) * 4 for (w, b) in padded_params))
    return pl.CostEstimate(flops=flops, transcendentals=0, bytes_accessed=byts)


def _fused_mlp_once(x2d, padded_params, *, tm, vmem_limit, single_buffer_weights):
    m, k_in = x2d.shape
    num_layers = len(padded_params)
    n_out = padded_params[-1][0].shape[1]
    assert m % tm == 0

    weight_mode = {}
    if single_buffer_weights:
        # Constant-index operands are DMA'd once; one buffer is enough.
        weight_mode = dict(pipeline_mode=pl.Buffered(1))

    in_specs = [pl.BlockSpec((tm, k_in), lambda i: (i, 0))]
    args = [x2d]
    for (w, b) in padded_params:
        kin, kout = w.shape
        # Constant block index -> copied to VMEM once, resident for all tiles.
        in_specs.append(pl.BlockSpec((kin, kout), lambda i: (0, 0), **weight_mode))
        in_specs.append(pl.BlockSpec((1, kout), lambda i: (0, 0), **weight_mode))
        args.append(w)
        args.append(b)

    return pl.pallas_call(
        functools.partial(_fused_mlp_kernel, num_layers=num_layers),
        out_shape=jax.ShapeDtypeStruct((m, n_out), x2d.dtype),
        grid=(m // tm,),
        in_specs=in_specs,
        out_specs=pl.BlockSpec((tm, n_out), lambda i: (i, 0)),
        compiler_params=pltpu.CompilerParams(
            dimension_semantics=("parallel",),   # row tiles independent (megacore)
            vmem_limit_bytes=vmem_limit,
        ),
        cost_estimate=_fused_cost(m, k_in, padded_params),
    )(*args)


_SINGLE_BUFFER_WEIGHTS_OK = None   # probe cache for pl.Buffered(1) support


def fused_mlp(x2d, padded_params, *, tm, vmem_limit):
    """Fused MLP forward; probes single-buffered resident weights once."""
    global _SINGLE_BUFFER_WEIGHTS_OK
    if _SINGLE_BUFFER_WEIGHTS_OK is None:
        try:
            out = _fused_mlp_once(x2d, padded_params, tm=tm, vmem_limit=vmem_limit,
                                  single_buffer_weights=True)
            _SINGLE_BUFFER_WEIGHTS_OK = True
            return out
        except Exception:
            # pipeline_mode=Buffered(1) not supported here -> default buffering.
            _SINGLE_BUFFER_WEIGHTS_OK = False
    return _fused_mlp_once(x2d, padded_params, tm=tm, vmem_limit=vmem_limit,
                           single_buffer_weights=_SINGLE_BUFFER_WEIGHTS_OK)


# ---------------------------------------------------------------------------
# Per-layer fallback: used when the all-weights-resident footprint would
# exceed the VMEM budget (e.g. very large hidden dims on v7x's 64 MiB).
# ---------------------------------------------------------------------------

def _linear_kernel(x_ref, w_ref, b_ref, o_ref, *, relu):
    h = jnp.dot(x_ref[...].astype(jnp.bfloat16), w_ref[...],
                preferred_element_type=jnp.float32)
    h = h + b_ref[...]
    if relu:
        h = jnp.maximum(h, 0.0)
    o_ref[...] = h.astype(o_ref.dtype)


def _linear_layer(x2d, w, b, *, relu, tm, vmem_cap):
    # TODO(synk): tile the contraction dim K with an 'arbitrary' grid axis +
    # f32 accumulator scratch if a single (tm, K) slab ever exceeds VMEM.
    m, k = x2d.shape
    n = w.shape[1]                                  # multiple of 128 (padded)
    tn = 256 if n % 256 == 0 else 128
    est = 2 * (tm * k * 4 + k * tn * 2 + tn * 4 + tm * tn * 4) + 2 * tm * tn * 4
    vmem_limit = min(max(32 << 20, int(1.4 * est) + (2 << 20)),
                     int(0.9 * vmem_cap))
    return pl.pallas_call(
        functools.partial(_linear_kernel, relu=relu),
        out_shape=jax.ShapeDtypeStruct((m, n), x2d.dtype),
        grid=(m // tm, n // tn),
        in_specs=[pl.BlockSpec((tm, k), lambda i, j: (i, 0)),
                  pl.BlockSpec((k, tn), lambda i, j: (0, j)),
                  pl.BlockSpec((1, tn), lambda i, j: (0, j))],
        out_specs=pl.BlockSpec((tm, tn), lambda i, j: (i, j)),
        compiler_params=pltpu.CompilerParams(
            dimension_semantics=("parallel", "parallel"),
            vmem_limit_bytes=vmem_limit,
        ),
        cost_estimate=pl.CostEstimate(
            flops=2 * m * k * n, transcendentals=0,
            bytes_accessed=m * k * 4 + k * n * 2 + n * 4 + m * n * 4),
    )(x2d, w, b)


def layered_mlp(x2d, padded_params, *, tm, vmem_cap):
    h = x2d
    last = len(padded_params) - 1
    for idx, (w, b) in enumerate(padded_params):
        h = _linear_layer(h, w, b, relu=(idx < last), tm=tm, vmem_cap=vmem_cap)
    return h


# ---------------------------------------------------------------------------
# Row tiling: minimal padding, exact-dividing tiles, megacore-friendly counts.
# ---------------------------------------------------------------------------

def _pick_row_tiling(m, max_tm=512):
    """Return (m_pad, tm): m padded only to a multiple of 8; tm divides m_pad,
    is 8-aligned (or equals m_pad), preferring an even tile count for v7x."""
    m_pad = _round_up(m, 8)
    if m_pad <= max_tm:
        if m_pad >= 256 and (m_pad // 2) % 8 == 0:
            return m_pad, m_pad // 2           # 2 row tiles -> both TCs busy
        return m_pad, m_pad                    # single tile
    best, best_even = None, None
    t = (max_tm // 8) * 8
    while t >= 64:
        if m_pad % t == 0:
            if best is None:
                best = t
            if best_even is None and (m_pad // t) % 2 == 0:
                best_even = t
            if best is not None and best_even is not None:
                break
        t -= 8
    if best_even is not None and 2 * best_even >= (best or 0):
        return m_pad, best_even
    if best is not None:
        return m_pad, best
    # Awkward M (no reasonable divisor): pay a one-time row pad so tiles stay
    # large and even in count.
    m_pad = _round_up(m, 2 * max_tm)
    return m_pad, max_tm


# ---------------------------------------------------------------------------
# Module
# ---------------------------------------------------------------------------

class MLP:
    """JAX/Pallas port of the PyTorch MLP: (L-1) x [Linear+ReLU] then Linear."""

    def __init__(self, input_dim, hidden_dim, output_dim, L=2, *, key, max_tm=512):
        self.L = L
        self.input_dim = input_dim
        self.output_dim = output_dim
        self.max_tm = max_tm

        # Layer shapes exactly as the PyTorch module: U layers then V.
        dims = [(input_dim, hidden_dim)]
        if L > 2:
            dims += [(hidden_dim, hidden_dim)] * (L - 2)
        dims += [(hidden_dim, output_dim)]

        # nn.Linear default init: U(-1/sqrt(fan_in), 1/sqrt(fan_in)).
        self.params = []
        for (din, dout) in dims:
            key, kw, kb = jax.random.split(key, 3)
            bound = 1.0 / (din ** 0.5)
            w = jax.random.uniform(kw, (din, dout), jnp.float32, -bound, bound)
            b = jax.random.uniform(kb, (dout,), jnp.float32, -bound, bound)
            self.params.append((w, b))

        # Pad feature dims to multiples of 128 (lane-dense MXU tiles / stores).
        # The FIRST layer keeps its true input dim so x never needs a runtime
        # K-pad; zero rows/cols + zero bias pad keep padded lanes exactly 0
        # through bias+ReLU.  Weights stored bf16 (MXU peak dtype, half the
        # resident VMEM/HBM bytes); biases stay f32 for the f32 VPU epilogue.
        self.padded_params = []
        for idx, (w, b) in enumerate(self.params):
            din, dout = w.shape
            dp = din if idx == 0 else _round_up(din, 128)
            op = _round_up(dout, 128)
            wp = jnp.zeros((dp, op), jnp.bfloat16).at[:din, :dout].set(
                w.astype(jnp.bfloat16))
            bp = jnp.zeros((1, op), jnp.float32).at[0, :dout].set(b)
            self.padded_params.append((wp, bp))
        self.n_out_pad = self.padded_params[-1][0].shape[1]

    def __call__(self, x):
        lead = x.shape[:-1]
        k = x.shape[-1]
        assert k == self.input_dim
        x2d = x.reshape(-1, k)
        m = x2d.shape[0]

        vmem_cap = _vmem_capacity_bytes()
        budget = int(0.75 * vmem_cap)

        # Pick the row tiling; shrink the tile if the fused kernel would not
        # fit the VMEM budget at that tile size.  If even the smallest tile
        # cannot hold all resident weights, fall back to per-layer kernels.
        max_tm = self.max_tm
        fused = True
        while True:
            m_pad, tm = _pick_row_tiling(m, max_tm)
            est = _fused_vmem_estimate(tm, k, self.padded_params)
            if est <= budget:
                break
            if max_tm <= 64:
                fused = False
                m_pad, tm = _pick_row_tiling(m, 256)
                break
            max_tm //= 2

        # Minimal row pad (multiple of 8 / exact tile divisor); K never padded.
        if m_pad != m:
            x2d = jnp.zeros((m_pad, k), x2d.dtype).at[:m, :].set(x2d)

        if fused:
            vmem_limit = min(max(32 << 20, int(1.4 * est) + (2 << 20)),
                             int(0.9 * vmem_cap))
            y = fused_mlp(x2d, self.padded_params, tm=tm, vmem_limit=vmem_limit)
        else:
            y = layered_mlp(x2d, self.padded_params, tm=tm, vmem_cap=vmem_cap)

        # Strip padding only when there is any (no extra HBM pass for aligned
        # shapes).
        if m_pad != m:
            y = y[:m]
        if self.n_out_pad != self.output_dim:
            y = y[:, : self.output_dim]
        return y.reshape(*lead, self.output_dim)

    def reference(self, x):
        h = x
        n = len(self.params)
        for i, (w, b) in enumerate(self.params):
            h = h @ w + b
            if i < n - 1:
                h = jnp.maximum(h, 0.0)
        return h


if __name__ == "__main__":
    key = jax.random.PRNGKey(0)
    kx, kp = jax.random.split(key)

    # batch=2, nodes=8, input_dim=16 -> hidden=32 (two ReLU layers, L=3) -> out=8
    x = jax.random.normal(kx, (2, 8, 16), jnp.float32)
    mlp = MLP(input_dim=16, hidden_dim=32, output_dim=8, L=3, key=kp)

    y = jax.block_until_ready(mlp(x))
    y_ref = mlp.reference(x)

    assert y.shape == (2, 8, 8)
    # bf16 matmul operands with f32 accumulation -> looser tolerance vs the
    # pure-f32 reference.
    assert jnp.allclose(y, y_ref, atol=3e-2, rtol=3e-2), "mismatch vs reference"

    print("KERNEL_OK")
</pallas_src>

<mosaic_0001>
module attributes {stable_mosaic.version = 11 : i64} {
  func.func @_fused_mlp_kernel(%arg0: i32, %arg1: memref<16x16xf32, #tpu.memory_space<vmem>>, %arg2: memref<16x128xbf16, #tpu.memory_space<vmem>>, %arg3: memref<1x128xf32, #tpu.memory_space<vmem>>, %arg4: memref<128x128xbf16, #tpu.memory_space<vmem>>, %arg5: memref<1x128xf32, #tpu.memory_space<vmem>>, %arg6: memref<128x128xbf16, #tpu.memory_space<vmem>>, %arg7: memref<1x128xf32, #tpu.memory_space<vmem>>, %arg8: memref<16x128xf32, #tpu.memory_space<vmem>>) attributes {dimension_semantics = [#tpu.dimension_semantics<parallel>], iteration_bounds = array<i64: 1>, scalar_prefetch = 0 : i64, scratch_operands = 0 : i64, tpu.core_type = #tpu.core_type<tc>, window_params = [{transform_indices = @transform_0, window_bounds = array<i64: 16, 16>}, {pipeline_mode = #tpu.pipeline_mode<synchronous>, transform_indices = @transform_1, window_bounds = array<i64: 16, 128>}, {pipeline_mode = #tpu.pipeline_mode<synchronous>, transform_indices = @transform_2, window_bounds = array<i64: 1, 128>}, {pipeline_mode = #tpu.pipeline_mode<synchronous>, transform_indices = @transform_3, window_bounds = array<i64: 128, 128>}, {pipeline_mode = #tpu.pipeline_mode<synchronous>, transform_indices = @transform_4, window_bounds = array<i64: 1, 128>}, {pipeline_mode = #tpu.pipeline_mode<synchronous>, transform_indices = @transform_5, window_bounds = array<i64: 128, 128>}, {pipeline_mode = #tpu.pipeline_mode<synchronous>, transform_indices = @transform_6, window_bounds = array<i64: 1, 128>}, {transform_indices = @transform_7, window_bounds = array<i64: 16, 128>}]} {
    %c0 = arith.constant 0 : index
    %c0_0 = arith.constant 0 : index
    %0 = vector.load %arg1[%c0, %c0_0] : memref<16x16xf32, #tpu.memory_space<vmem>>, vector<16x16xf32>
    %1 = arith.truncf %0 : vector<16x16xf32> to vector<16x16xbf16>
    %c0_1 = arith.constant 0 : index
    %c0_2 = arith.constant 0 : index
    %2 = vector.load %arg2[%c0_1, %c0_2] : memref<16x128xbf16, #tpu.memory_space<vmem>>, vector<16x128xbf16>
    %cst = arith.constant dense<0.000000e+00> : vector<16x128xf32>
    %3 = tpu.matmul %1, %2, %cst {dimension_numbers = #tpu.dot_dimension_numbers<[1], [0], [0], [1], [0, 0, 1, 1], [], []>} : vector<16x16xbf16>, vector<16x128xbf16>, vector<16x128xf32> -> vector<16x128xf32>
    %c0_3 = arith.constant 0 : index
    %c0_4 = arith.constant 0 : index
    %4 = vector.load %arg3[%c0_3, %c0_4] : memref<1x128xf32, #tpu.memory_space<vmem>>, vector<1x128xf32>
    %5 = vector.broadcast %4 : vector<1x128xf32> to vector<16x128xf32>
    %6 = arith.addf %3, %5 : vector<16x128xf32>
    %cst_5 = arith.constant 0.000000e+00 : f32
    %7 = vector.broadcast %cst_5 : f32 to vector<16x128xf32>
    %8 = arith.maximumf %6, %7 : vector<16x128xf32>
    %9 = arith.truncf %8 : vector<16x128xf32> to vector<16x128xbf16>
    %c0_6 = arith.constant 0 : index
    %c0_7 = arith.constant 0 : index
    %10 = vector.load %arg4[%c0_6, %c0_7] : memref<128x128xbf16, #tpu.memory_space<vmem>>, vector<128x128xbf16>
    %cst_8 = arith.constant dense<0.000000e+00> : vector<16x128xf32>
    %11 = tpu.matmul %9, %10, %cst_8 {dimension_numbers = #tpu.dot_dimension_numbers<[1], [0], [0], [1], [0, 0, 1, 1], [], []>} : vector<16x128xbf16>, vector<128x128xbf16>, vector<16x128xf32> -> vector<16x128xf32>
    %c0_9 = arith.constant 0 : index
    %c0_10 = arith.constant 0 : index
    %12 = vector.load %arg5[%c0_9, %c0_10] : memref<1x128xf32, #tpu.memory_space<vmem>>, vector<1x128xf32>
    %13 = vector.broadcast %12 : vector<1x128xf32> to vector<16x128xf32>
    %14 = arith.addf %11, %13 : vector<16x128xf32>
    %cst_11 = arith.constant 0.000000e+00 : f32
    %15 = vector.broadcast %cst_11 : f32 to vector<16x128xf32>
    %16 = arith.maximumf %14, %15 : vector<16x128xf32>
    %17 = arith.truncf %16 : vector<16x128xf32> to vector<16x128xbf16>
    %c0_12 = arith.constant 0 : index
    %c0_13 = arith.constant 0 : index
    %18 = vector.load %arg6[%c0_12, %c0_13] : memref<128x128xbf16, #tpu.memory_space<vmem>>, vector<128x128xbf16>
    %cst_14 = arith.constant dense<0.000000e+00> : vector<16x128xf32>
    %19 = tpu.matmul %17, %18, %cst_14 {dimension_numbers = #tpu.dot_dimension_numbers<[1], [0], [0], [1], [0, 0, 1, 1], [], []>} : vector<16x128xbf16>, vector<128x128xbf16>, vector<16x128xf32> -> vector<16x128xf32>
    %c0_15 = arith.constant 0 : index
    %c0_16 = arith.constant 0 : index
    %20 = vector.load %arg7[%c0_15, %c0_16] : memref<1x128xf32, #tpu.memory_space<vmem>>, vector<1x128xf32>
    %21 = vector.broadcast %20 : vector<1x128xf32> to vector<16x128xf32>
    %22 = arith.addf %19, %21 : vector<16x128xf32>
    %c0_17 = arith.constant 0 : index
    %c0_18 = arith.constant 0 : index
    %23 = vector.load %arg8[%c0_17, %c0_18] : memref<16x128xf32, #tpu.memory_space<vmem>>, vector<16x128xf32>
    tpu.vector_store %arg8[%c0_17, %c0_18], %22 {strides = array<i32>} : memref<16x128xf32, #tpu.memory_space<vmem>>, vector<16x128xf32>,
    return
  }
  func.func @transform_0(%arg0: i32) -> (i32, i32) {
    %c0_i32 = arith.constant 0 : i32
    %c0_i32_0 = arith.constant 0 : i32
    return %arg0, %c0_i32 : i32, i32
  }
  func.func @transform_1(%arg0: i32) -> (i32, i32) {
    %c0_i32 = arith.constant 0 : i32
    %c0_i32_0 = arith.constant 0 : i32
    %c0_i32_1 = arith.constant 0 : i32
    return %c0_i32, %c0_i32_0 : i32, i32
  }
  func.func @transform_2(%arg0: i32) -> (i32, i32) {
    %c0_i32 = arith.constant 0 : i32
    %c0_i32_0 = arith.constant 0 : i32
    %c0_i32_1 = arith.constant 0 : i32
    return %c0_i32, %c0_i32_0 : i32, i32
  }
  func.func @transform_3(%arg0: i32) -> (i32, i32) {
    %c0_i32 = arith.constant 0 : i32
    %c0_i32_0 = arith.constant 0 : i32
    %c0_i32_1 = arith.constant 0 : i32
    return %c0_i32, %c0_i32_0 : i32, i32
  }
  func.func @transform_4(%arg0: i32) -> (i32, i32) {
    %c0_i32 = arith.constant 0 : i32
    %c0_i32_0 = arith.constant 0 : i32
    %c0_i32_1 = arith.constant 0 : i32
    return %c0_i32, %c0_i32_0 : i32, i32
  }
  func.func @transform_5(%arg0: i32) -> (i32, i32) {
    %c0_i32 = arith.constant 0 : i32
    %c0_i32_0 = arith.constant 0 : i32
    %c0_i32_1 = arith.constant 0 : i32
    return %c0_i32, %c0_i32_0 : i32, i32
  }
  func.func @transform_6(%arg0: i32) -> (i32, i32) {
    %c0_i32 = arith.constant 0 : i32
    %c0_i32_0 = arith.constant 0 : i32
    %c0_i32_1 = arith.constant 0 : i32
    return %c0_i32, %c0_i32_0 : i32, i32
  }
  func.func @transform_7(%arg0: i32) -> (i32, i32) {
    %c0_i32 = arith.constant 0 : i32
    %c0_i32_0 = arith.constant 0 : i32
    return %arg0, %c0_i32 : i32, i32
  }
}

module attributes {stable_mosaic.version = 11 : i64} {
  func.func @_fused_mlp_kernel(%arg0: i32, %arg1: memref<16x16xf32, #tpu.memory_space<vmem>>, %arg2: memref<16x128xbf16, #tpu.memory_space<vmem>>, %arg3: memref<1x128xf32, #tpu.memory_space<vmem>>, %arg4: memref<128x128xbf16, #tpu.memory_space<vmem>>, %arg5: memref<1x128xf32, #tpu.memory_space<vmem>>, %arg6: memref<128x128xbf16, #tpu.memory_space<vmem>>, %arg7: memref<1x128xf32, #tpu.memory_space<vmem>>, %arg8: memref<16x128xf32, #tpu.memory_space<vmem>>) attributes {dimension_semantics = [#tpu.dimension_semantics<parallel>], iteration_bounds = array<i64: 1>, scalar_prefetch = 0 : i64, scratch_operands = 0 : i64, tpu.core_type = #tpu.core_type<tc>, window_params = [{transform_indices = @transform_0, window_bounds = array<i64: 16, 16>}, {pipeline_mode = #tpu.pipeline_mode<synchronous>, transform_indices = @transform_1, window_bounds = array<i64: 16, 128>}, {pipeline_mode = #tpu.pipeline_mode<synchronous>, transform_indices = @transform_2, window_bounds = array<i64: 1, 128>}, {pipeline_mode = #tpu.pipeline_mode<synchronous>, transform_indices = @transform_3, window_bounds = array<i64: 128, 128>}, {pipeline_mode = #tpu.pipeline_mode<synchronous>, transform_indices = @transform_4, window_bounds = array<i64: 1, 128>}, {pipeline_mode = #tpu.pipeline_mode<synchronous>, transform_indices = @transform_5, window_bounds = array<i64: 128, 128>}, {pipeline_mode = #tpu.pipeline_mode<synchronous>, transform_indices = @transform_6, window_bounds = array<i64: 1, 128>}, {transform_indices = @transform_7, window_bounds = array<i64: 16, 128>}]} {
    %c0 = arith.constant 0 : index
    %c0_0 = arith.constant 0 : index
    %0 = vector.load %arg1[%c0, %c0_0] : memref<16x16xf32, #tpu.memory_space<vmem>>, vector<16x16xf32>
    %1 = arith.truncf %0 : vector<16x16xf32> to vector<16x16xbf16>
    %c0_1 = arith.constant 0 : index
    %c0_2 = arith.constant 0 : index
    %2 = vector.load %arg2[%c0_1, %c0_2] : memref<16x128xbf16, #tpu.memory_space<vmem>>, vector<16x128xbf16>
    %cst = arith.constant dense<0.000000e+00> : vector<16x128xf32>
    %3 = tpu.matmul %1, %2, %cst {dimension_numbers = #tpu.dot_dimension_numbers<[1], [0], [0], [1], [0, 0, 1, 1], [], []>} : vector<16x16xbf16>, vector<16x128xbf16>, vector<16x128xf32> -> vector<16x128xf32>
    %c0_3 = arith.constant 0 : index
    %c0_4 = arith.constant 0 : index
    %4 = vector.load %arg3[%c0_3, %c0_4] : memref<1x128xf32, #tpu.memory_space<vmem>>, vector<1x128xf32>
    %5 = vector.broadcast %4 : vector<1x128xf32> to vector<16x128xf32>
    %6 = arith.addf %3, %5 : vector<16x128xf32>
    %cst_5 = arith.constant 0.000000e+00 : f32
    %7 = vector.broadcast %cst_5 : f32 to vector<16x128xf32>
    %8 = arith.maximumf %6, %7 : vector<16x128xf32>
    %9 = arith.truncf %8 : vector<16x128xf32> to vector<16x128xbf16>
    %c0_6 = arith.constant 0 : index
    %c0_7 = arith.constant 0 : index
    %10 = vector.load %arg4[%c0_6, %c0_7] : memref<128x128xbf16, #tpu.memory_space<vmem>>, vector<128x128xbf16>
    %cst_8 = arith.constant dense<0.000000e+00> : vector<16x128xf32>
    %11 = tpu.matmul %9, %10, %cst_8 {dimension_numbers = #tpu.dot_dimension_numbers<[1], [0], [0], [1], [0, 0, 1, 1], [], []>} : vector<16x128xbf16>, vector<128x128xbf16>, vector<16x128xf32> -> vector<16x128xf32>
    %c0_9 = arith.constant 0 : index
    %c0_10 = arith.constant 0 : index
    %12 = vector.load %arg5[%c0_9, %c0_10] : memref<1x128xf32, #tpu.memory_space<vmem>>, vector<1x128xf32>
    %13 = vector.broadcast %12 : vector<1x128xf32> to vector<16x128xf32>
    %14 = arith.addf %11, %13 : vector<16x128xf32>
    %cst_11 = arith.constant 0.000000e+00 : f32
    %15 = vector.broadcast %cst_11 : f32 to vector<16x128xf32>
    %16 = arith.maximumf %14, %15 : vector<16x128xf32>
    %17 = arith.truncf %16 : vector<16x128xf32> to vector<16x128xbf16>
    %c0_12 = arith.constant 0 : index
    %c0_13 = arith.constant 0 : index
    %18 = vector.load %arg6[%c0_12, %c0_13] : memref<128x128xbf16, #tpu.memory_space<vmem>>, vector<128x128xbf16>
    %cst_14 = arith.constant dense<0.000000e+00> : vector<16x128xf32>
    %19 = tpu.matmul %17, %18, %cst_14 {dimension_numbers = #tpu.dot_dimension_numbers<[1], [0], [0], [1], [0, 0, 1, 1], [], []>} : vector<16x128xbf16>, vector<128x128xbf16>, vector<16x128xf32> -> vector<16x128xf32>
    %c0_15 = arith.constant 0 : index
    %c0_16 = arith.constant 0 : index
    %20 = vector.load %arg7[%c0_15, %c0_16] : memref<1x128xf32, #tpu.memory_space<vmem>>, vector<1x128xf32>
    %21 = vector.broadcast %20 : vector<1x128xf32> to vector<16x128xf32>
    %22 = arith.addf %19, %21 : vector<16x128xf32>
    %c0_17 = arith.constant 0 : index
    %c0_18 = arith.constant 0 : index
    %23 = vector.load %arg8[%c0_17, %c0_18] : memref<16x128xf32, #tpu.memory_space<vmem>>, vector<16x128xf32>
    tpu.vector_store %arg8[%c0_17, %c0_18], %22 {strides = array<i32>} : memref<16x128xf32, #tpu.memory_space<vmem>>, vector<16x128xf32>,
    return
  }
  func.func @transform_0(%arg0: i32) -> (i32, i32) {
    %c0_i32 = arith.constant 0 : i32
    %c0_i32_0 = arith.constant 0 : i32
    return %arg0, %c0_i32 : i32, i32
  }
  func.func @transform_1(%arg0: i32) -> (i32, i32) {
    %c0_i32 = arith.constant 0 : i32
    %c0_i32_0 = arith.constant 0 : i32
    %c0_i32_1 = arith.constant 0 : i32
    return %c0_i32, %c0_i32_0 : i32, i32
  }
  func.func @transform_2(%arg0: i32) -> (i32, i32) {
    %c0_i32 = arith.constant 0 : i32
    %c0_i32_0 = arith.constant 0 : i32
    %c0_i32_1 = arith.constant 0 : i32
    return %c0_i32, %c0_i32_0 : i32, i32
  }
  func.func @transform_3(%arg0: i32) -> (i32, i32) {
    %c0_i32 = arith.constant 0 : i32
    %c0_i32_0 = arith.constant 0 : i32
    %c0_i32_1 = arith.constant 0 : i32
    return %c0_i32, %c0_i32_0 : i32, i32
  }
  func.func @transform_4(%arg0: i32) -> (i32, i32) {
    %c0_i32 = arith.constant 0 : i32
    %c0_i32_0 = arith.constant 0 : i32
    %c0_i32_1 = arith.constant 0 : i32
    return %c0_i32, %c0_i32_0 : i32, i32
  }
  func.func @transform_5(%arg0: i32) -> (i32, i32) {
    %c0_i32 = arith.constant 0 : i32
    %c0_i32_0 = arith.constant 0 : i32
    %c0_i32_1 = arith.constant 0 : i32
    return %c0_i32, %c0_i32_0 : i32, i32
  }
  func.func @transform_6(%arg0: i32) -> (i32, i32) {
    %c0_i32 = arith.constant 0 : i32
    %c0_i32_0 = arith.constant 0 : i32
    %c0_i32_1 = arith.constant 0 : i32
    return %c0_i32, %c0_i32_0 : i32, i32
  }
  func.func @transform_7(%arg0: i32) -> (i32, i32) {
    %c0_i32 = arith.constant 0 : i32
    %c0_i32_0 = arith.constant 0 : i32
    return %arg0, %c0_i32 : i32, i32
  }
}

</mosaic_0001>

<bundles_post_ra>
// kernel: tpu_custom_call.1
= control target key start
LH: loop header
LB: loop body
LE: loop exit
PB: predicated region body
PF: predicated region fallthrough
CT: control target
= control target key end

     0   :  { %12 = vsyncpa [#allocation3], 0  ;;  %s795_s0 = inlined_call_operand.hbm [shape: f32[16,16], index: 0, kind: input, shape index: {}]   ;;  %s796_s1 = inlined_call_operand.hbm [shape: bf16[16,128], index: 1, kind: input, shape index: {}]   ;;  %s797_s2 = inlined_call_operand.vmem [shape: f32[1,128], index: 2, kind: input, shape index: {}]   ;;  %s798_s3 = inlined_call_operand.hbm [shape: bf16[128,128], index: 3, kind: input, shape index: {}]   ;;  %s799_s4 = inlined_call_operand.vmem [shape: f32[1,128], index: 4, kind: input, shape index: {}]   ;;  %s800_s5 = inlined_call_operand.hbm [shape: bf16[128,128], index: 5, kind: input, shape index: {}]   ;;  %s801_s6 = inlined_call_operand.vmem [shape: f32[1,128], index: 6, kind: input, shape index: {}]   ;;  %s802_s7 = inlined_call_operand.hbm [shape: f32[16,128], index: 7, kind: output, shape index: {}]  }
   0x1   :  { %13 = vsyncpa [#allocation6], 0 }
   0x2   :  { %14 = vsyncpa [#allocation9], 0 }
   0x3   :  { %15 = vsyncpa [#allocation4], 0  ;;  %s630_s24 = smov [#allocation5]   ;;  %s512_s28 = scalar_lea.hbm %s796_s1, 128 }
   0x4   :  { %s33_s25 = sshll.u32 %s630_s24, 4  ;;  %p513_p0 = scmp.ne.s32.totalorder %s796_s1, %s512_s28  ;;  %s34_s25 = int_to_ptr.vmem [resolvable:$true] %s33_s25 }
   0x5   :  { %p516_p1 = scmp.lt.u32.totalorder %s512_s28, %s796_s1 }
   0x7   :  { %p518_p2 = pnand %p516_p1, %p513_p0 }
   0x9   :  { %521 = shalt.err (!%p518_p2)
}
   0xa   :  { %s522_s10 = scalar_lea.vmem %s34_s25, 128  ;;  %p527_p4 = scmp.lt.s32.totalorder %s34_s25, %s34_s25 }
   0xb   :  { %p523_p3 = scmp.ne.s32.totalorder %s34_s25, %s522_s10  ;;  %p528_p5 = scmp.lt.s32.totalorder %s522_s10, %s522_s10 }
   0xd   :  { %p529_p6 = por %p528_p5, %p527_p4 }
   0xf   :  { %p530_p7 = pnand %p529_p6, %p523_p3 }
  0x11   :  { %533 = shalt.err (!%p530_p7)
}
  0x12   :  { %s631_s11 = smov 64   ;;  %s632_s12 = smov 4  }
  0x13   :  { %39 = dma.hbm_to_vmem [thread:$0]  %s796_s1, 128, %s34_s25, [#allocation6], %s631_s11, %s631_s11, %s632_s12  }
  0x14   :  { %s633_s15 = smov [#allocation2]   ;;  %s534_s19 = scalar_lea.hbm %s795_s0, 256 }
  0x15   :  { %s21_s16 = sshll.u32 %s633_s15, 4  ;;  %p535_p8 = scmp.ne.s32.totalorder %s795_s0, %s534_s19  ;;  %s22_s16 = int_to_ptr.vmem [resolvable:$true] %s21_s16 }
  0x16   :  { %p538_p9 = scmp.lt.u32.totalorder %s534_s19, %s795_s0 }
  0x18   :  { %p540_p10 = pnand %p538_p9, %p535_p8 }
  0x1a   :  { %543 = shalt.err (!%p540_p10)
}
  0x1b   :  { %s544_s24 = scalar_lea.vmem %s22_s16, 256  ;;  %p549_p12 = scmp.lt.s32.totalorder %s22_s16, %s22_s16 }
  0x1c   :  { %p545_p11 = scmp.ne.s32.totalorder %s22_s16, %s544_s24  ;;  %p550_p13 = scmp.lt.s32.totalorder %s544_s24, %s544_s24 }
  0x1e   :  { %p551_p0 = por %p550_p13, %p549_p12 }
  0x20   :  { %p552_p1 = pnand %p551_p0, %p545_p11 }
  0x22   :  { %555 = shalt.err (!%p552_p1)
}
  0x23   :  { %s634_s1 = smov 128   ;;  %s635_s25 = smov 8  }
  0x24   :  { %27 = dma.hbm_to_vmem [thread:$0]  %s795_s0, 256, %s22_s16, [#allocation3], %s634_s1, %s634_s1, %s635_s25  }
  0x25   :  { %s636_s28 = smov [#allocation7]   ;;  %s637_s30 = smov [#allocation8]  }
  0x26   :  { %s47_s29 = sshll.u32 %s636_s28, 4  ;;  %s61_s8 = sshll.u32 %s637_s30, 4  ;;  %s48_s29 = int_to_ptr.vmem [resolvable:$true] %s47_s29  ;;  %s711_s8 = int_to_ptr.vmem [resolvable:$true] %s61_s8 }
  0x27   :  { %s556_s13 = scalar_lea.hbm %s798_s3, 1024 }
  0x28   :  { %p557_p2 = scmp.ne.s32.totalorder %s798_s3, %s556_s13  ;;  %p560_p3 = scmp.lt.u32.totalorder %s556_s13, %s798_s3 }
  0x2a   :  { %p562_p4 = pnand %p560_p3, %p557_p2 }
  0x2c   :  { %565 = shalt.err (!%p562_p4)
}
  0x2d   :  { %s566_s0 = scalar_lea.vmem %s48_s29, 1024  ;;  %p571_p6 = scmp.lt.s32.totalorder %s48_s29, %s48_s29 }
  0x2e   :  { %p567_p5 = scmp.ne.s32.totalorder %s48_s29, %s566_s0  ;;  %p572_p7 = scmp.lt.s32.totalorder %s566_s0, %s566_s0 }
  0x30   :  { %p573_p8 = por %p572_p7, %p571_p6 }
  0x32   :  { %p574_p9 = pnand %p573_p8, %p567_p5 }
  0x34   :  { %577 = shalt.err (!%p574_p9)
}
  0x35   :  { %53 = dma.hbm_to_vmem [thread:$0]  %s798_s3, 1024, %s48_s29, [#allocation6], %s631_s11, %s631_s11, %s632_s12  }
  0x36   :  { %s578_s22 = scalar_lea.hbm %s800_s5, 1024 }
  0x37   :  { %p579_p10 = scmp.ne.s32.totalorder %s800_s5, %s578_s22  ;;  %p582_p11 = scmp.lt.u32.totalorder %s578_s22, %s800_s5 }
  0x39   :  { %p584_p12 = pnand %p582_p11, %p579_p10 }
  0x3b   :  { %587 = shalt.err (!%p584_p12)
}
  0x3c   :  { %s588_s28 = scalar_lea.vmem %s711_s8, 1024  ;;  %p593_p0 = scmp.lt.s32.totalorder %s711_s8, %s711_s8 }
  0x3d   :  { %p589_p13 = scmp.ne.s32.totalorder %s711_s8, %s588_s28  ;;  %p594_p1 = scmp.lt.s32.totalorder %s588_s28, %s588_s28 }
  0x3f   :  { %p595_p2 = por %p594_p1, %p593_p0 }
  0x41   :  { %p596_p3 = pnand %p595_p2, %p589_p13 }
  0x43   :  { %599 = shalt.err (!%p596_p3)
}
  0x44   :  { %67 = dma.hbm_to_vmem [thread:$0]  %s800_s5, 1024, %s711_s8, [#allocation9], %s631_s11, %s631_s11, %s632_s12  }
  0x45   :  { %622 = dma.done.wait [#allocation3], 256  }
  0x46   :  { %623 = vsyncadd [#allocation3], 4294967040 }
  0x47   :  { %624 = dma.done.wait [#allocation6], 1152  }
  0x48   :  { %625 = vsyncadd [#allocation6], 4294966144 }
  0x49   :  { %626 = dma.done.wait [#allocation9], 1024  }
  0x4a   :  { %627 = vsyncadd [#allocation9], 4294966272  ;;  %v638_v0 = vmov 0.0   ;;  %vm639_vm0 = vmmov 0   ;;  %v495_v1 = vld [vmem:[#allocation5] sm:$0xff]   ;;  %v83_v2 = vld [vmem:[#allocation2] sm:$0xff] }
  0x4b   :  { %438 = vmatprep.subr.bf16.mxu0 %v638_v0  ;;  %440 = vmatprep.mubr.msk.bf16.mxu0 %vm639_vm0, %v638_v0  ;;  %v84_v3 = vld [vmem:[#allocation2 + $0x8] sm:$0xff]  ;;  %vm101_vm1 = vcmask 130048   ;;  %v496_v5 = vld [vmem:[#allocation7] sm:$0xff]   ;;  %v497_v6 = vld [vmem:[#allocation7 + $0x8] sm:$0xff]   ;;  %s640_s9 = smov [#allocation10]  }
  0x4c   :  { %444 = vmatprep.subr.bf16.mxu1 %v638_v0  ;;  %460 = vmatprep.mubr.msk.bf16.mxu1 %vm639_vm0, %v638_v0  ;;  %v85_v4 = vpack.c.bf16 %v84_v3, %v83_v2  ;;  %v498_v7 = vld [vmem:[#allocation7 + $0x10] sm:$0xff]   ;;  %v499_v8 = vld [vmem:[#allocation7 + $0x18] sm:$0xff]   ;;  %v500_v9 = vld [vmem:[#allocation7 + $0x20] sm:$0xff]   ;;  %s383_s10 = sshll.u32 %s640_s9, 4  ;;  %s384_s10 = int_to_ptr.vmem [resolvable:$true] %s383_s10 }
  0x4d   :  { %439 = vmatpush3.bf16.msra.mxu0 %v495_v1  ;;  %445 = vmatpush3.bf16.msra.mxu1 %v496_v5  ;;  %v501_v10 = vld [vmem:[#allocation7 + $0x28] sm:$0xff]   ;;  %v502_v11 = vld [vmem:[#allocation7 + $0x30] sm:$0xff]   ;;  %v503_v12 = vld [vmem:[#allocation7 + $0x38] sm:$0xff]   ;;  %p605_p5 = scmp.lt.s32.totalorder %s384_s10, %s384_s10 }
  0x4e   :  { %464 = vmatprep.subr.bf16.mxu0 %v638_v0  ;;  %446 = vmatprep.subr.bf16.mxu1 %v638_v0  ;;  %v504_v13 = vld [vmem:[#allocation8] sm:$0xff]   ;;  %v505_v14 = vld [vmem:[#allocation8 + $0x8] sm:$0xff]   ;;  %v506_v15 = vld [vmem:[#allocation8 + $0x10] sm:$0xff]  }
  0x4f   :  { %v507_v16 = vld [vmem:[#allocation8 + $0x18] sm:$0xff]   ;;  %v508_v17 = vld [vmem:[#allocation8 + $0x20] sm:$0xff]   ;;  %v509_v18 = vld [vmem:[#allocation8 + $0x28] sm:$0xff]  }
  0x50   :  { %441 = vmatmul.mubr.msk.bf16.vlgmr.msra.gmra.mrb[0].mxu0 %vm101_vm1, %v85_v4  ;;  %v397_v19 = vld [vmem:[%s797_s2] ss:$0 sm:$0xff]  ;;  %v510_v29 = vld [vmem:[#allocation8 + $0x30] sm:$0xff]   ;;  %v511_v30 = vld [vmem:[#allocation8 + $0x38] sm:$0xff]  }
  0x51   :  { %480 = vmatprep.mubr.msk.bf16.mxu0 %vm639_vm0, %v638_v0  ;;  %447 = vmatpush3.bf16.msra.mxu1 %v497_v6  ;;  %v400_v31 = vld [vmem:[%s799_s4] ss:$0 sm:$0xff]  ;;  %s600_s4 = scalar_lea.vmem %s384_s10, 256 }
  0x52   :  { %448 = vmatprep.subr.bf16.mxu1 %v638_v0  ;;  %465 = vmatpush3.bf16.msra.mxu0 %v504_v13  ;;  %v409_v41 = vld [vmem:[%s801_s6] ss:$0 sm:$0xff]  ;;  %p601_p4 = scmp.ne.s32.totalorder %s384_s10, %s600_s4  ;;  %p606_p6 = scmp.lt.s32.totalorder %s600_s4, %s600_s4 }
  0x53   :  { %466 = vmatprep.subr.bf16.mxu0 %v638_v0 }
  0x54   :  { %p607_p7 = por %p606_p6, %p605_p5 }
  0x55   :  { %449 = vmatpush3.bf16.msra.mxu1 %v498_v7 }
  0x56   :  { %450 = vmatprep.subr.bf16.mxu1 %v638_v0  ;;  %467 = vmatpush3.bf16.msra.mxu0 %v505_v14  ;;  %p608_p8 = pnand %p607_p7, %p601_p4 }
  0x57   :  { %468 = vmatprep.subr.bf16.mxu0 %v638_v0 }
  0x59   :  { %451 = vmatpush3.bf16.msra.mxu1 %v499_v8 }
  0x5a   :  { %452 = vmatprep.subr.bf16.mxu1 %v638_v0  ;;  %469 = vmatpush3.bf16.msra.mxu0 %v506_v15 }
  0x5b   :  { %470 = vmatprep.subr.bf16.mxu0 %v638_v0 }
  0x5d   :  { %453 = vmatpush3.bf16.msra.mxu1 %v500_v9 }
  0x5e   :  { %454 = vmatprep.subr.bf16.mxu1 %v638_v0  ;;  %471 = vmatpush3.bf16.msra.mxu0 %v507_v16 }
  0x5f   :  { %472 = vmatprep.subr.bf16.mxu0 %v638_v0 }
  0x61   :  { %455 = vmatpush3.bf16.msra.mxu1 %v501_v10 }
  0x62   :  { %456 = vmatprep.subr.bf16.mxu1 %v638_v0  ;;  %473 = vmatpush3.bf16.msra.mxu0 %v508_v17 }
  0x63   :  { %474 = vmatprep.subr.bf16.mxu0 %v638_v0 }
  0x65   :  { %457 = vmatpush3.bf16.msra.mxu1 %v502_v11 }
  0x66   :  { %458 = vmatprep.subr.bf16.mxu1 %v638_v0  ;;  %475 = vmatpush3.bf16.msra.mxu0 %v509_v18 }
  0x67   :  { %476 = vmatprep.subr.bf16.mxu0 %v638_v0 }
  0x69   :  { %459 = vmatpush3.bf16.msra.mxu1 %v503_v12 }
  0x6a   :  { %477 = vmatpush3.bf16.msra.mxu0 %v510_v29 }
  0x6b   :  { %478 = vmatprep.subr.bf16.mxu0 %v638_v0 }
  0x6e   :  { %479 = vmatpush3.bf16.msra.mxu0 %v511_v30 }
 0x123   :  { %v139_v20 = vpop.f32.mrb[0].mxu0 }
 0x124   :  { %v140_v21 = vadd.f32 %v397_v19, %v139_v20  ;;  %v442_v22 = vpop.f32.mrb[1].mxu0 }
 0x125   :  { %v142_v23 = vpop.f32.mrb[2].mxu0 }
 0x126   :  { %v143_v24 = vadd.f32 %v397_v19, %v142_v23  ;;  %v443_v25 = vpop.f32.mrb[3].mxu0  ;;  %v146_v26 = vmax.f32 %v140_v21, 0.0 }
 0x128   :  { %v147_v27 = vmax.f32 %v143_v24, 0.0 }
 0x12a   :  { %v148_v28 = vpack.c.bf16 %v147_v27, %v146_v26 }
 0x12c   :  { %461 = vmatmul.mubr.bf16.vlgmr.msra.gmra.mrb[0].mxu1 %v148_v28 }
 0x1ff   :  { %v254_v32 = vpop.f32.mrb[0].mxu1 }
 0x200   :  { %v255_v33 = vadd.f32 %v400_v31, %v254_v32  ;;  %v462_v34 = vpop.f32.mrb[1].mxu1 }
 0x201   :  { %v257_v35 = vpop.f32.mrb[2].mxu1 }
 0x202   :  { %v258_v36 = vadd.f32 %v400_v31, %v257_v35  ;;  %v463_v37 = vpop.f32.mrb[3].mxu1  ;;  %v261_v38 = vmax.f32 %v255_v33, 0.0 }
 0x204   :  { %v262_v39 = vmax.f32 %v258_v36, 0.0 }
 0x206   :  { %v263_v40 = vpack.c.bf16 %v262_v39, %v261_v38 }
 0x208   :  { %481 = vmatmul.mubr.bf16.vlgmr.msra.gmra.mrb[4].mxu0 %v263_v40 }
 0x2db   :  { %v369_v42 = vpop.f32.mrb[4].mxu0 }
 0x2dc   :  { %v370_v43 = vadd.f32 %v409_v41, %v369_v42  ;;  %v482_v44 = vpop.f32.mrb[5].mxu0 }
 0x2dd   :  { %v372_v45 = vpop.f32.mrb[6].mxu0 }
 0x2de   :  { %376 = vst [vmem:[#allocation10] sm:$0xff] %v370_v43  ;;  %v373_v46 = vadd.f32 %v409_v41, %v372_v45  ;;  %v483_v47 = vpop.f32.mrb[7].mxu0 }
 0x2e0   :  { %377 = vst [vmem:[#allocation10 + $0x8] sm:$0xff] %v373_v46 }
 0x2e1   :  { %611 = shalt.err (!%p608_p8)
}
 0x2e2   :  { %s612_s14 = scalar_lea.hbm %s802_s7, 256 }
 0x2e3   :  { %p613_p9 = scmp.ne.s32.totalorder %s802_s7, %s612_s14  ;;  %p616_p10 = scmp.lt.u32.totalorder %s612_s14, %s802_s7 }
 0x2e5   :  { %p618_p11 = pnand %p616_p10, %p613_p9 }
 0x2e7   :  { %621 = shalt.err (!%p618_p11)
}
 0x2e8   :  { %389 = dma.vmem_to_hbm [thread:$0]  %s384_s10, 256, %s802_s7, [#allocation4], %s634_s1, %s634_s1, %s635_s25  }
 0x2e9   :  { %628 = dma.done.wait [#allocation4], 256  }
 0x2ea   :  { %629 = vsyncadd [#allocation4], 4294967040 }
 0x2eb   :  { %393 = vsyncpa [#allocation3], 1 }
 0x2ec   :  { %394 = vsyncpa [#allocation6], 1 }
 0x2ed   :  { %395 = vsyncpa [#allocation9], 1 }
 0x2ee   :  { %396 = vsyncpa [#allocation4], 1 }

// kernel: tpu_custom_call.1
= control target key start
LH: loop header
LB: loop body
LE: loop exit
PB: predicated region body
PF: predicated region fallthrough
CT: control target
= control target key end

     0   :  { %12 = vsyncpa [#allocation3], 0  ;;  %s795_s0 = inlined_call_operand.hbm [shape: f32[16,16], index: 0, kind: input, shape index: {}]   ;;  %s796_s1 = inlined_call_operand.hbm [shape: bf16[16,128], index: 1, kind: input, shape index: {}]   ;;  %s797_s2 = inlined_call_operand.vmem [shape: f32[1,128], index: 2, kind: input, shape index: {}]   ;;  %s798_s3 = inlined_call_operand.hbm [shape: bf16[128,128], index: 3, kind: input, shape index: {}]   ;;  %s799_s4 = inlined_call_operand.vmem [shape: f32[1,128], index: 4, kind: input, shape index: {}]   ;;  %s800_s5 = inlined_call_operand.hbm [shape: bf16[128,128], index: 5, kind: input, shape index: {}]   ;;  %s801_s6 = inlined_call_operand.vmem [shape: f32[1,128], index: 6, kind: input, shape index: {}]   ;;  %s802_s7 = inlined_call_operand.hbm [shape: f32[16,128], index: 7, kind: output, shape index: {}]  }
   0x1   :  { %13 = vsyncpa [#allocation6], 0 }
   0x2   :  { %14 = vsyncpa [#allocation9], 0 }
   0x3   :  { %15 = vsyncpa [#allocation4], 0  ;;  %s630_s24 = smov [#allocation5]   ;;  %s512_s28 = scalar_lea.hbm %s796_s1, 128 }
   0x4   :  { %s33_s25 = sshll.u32 %s630_s24, 4  ;;  %p513_p0 = scmp.ne.s32.totalorder %s796_s1, %s512_s28  ;;  %s34_s25 = int_to_ptr.vmem [resolvable:$true] %s33_s25 }
   0x5   :  { %p516_p1 = scmp.lt.u32.totalorder %s512_s28, %s796_s1 }
   0x7   :  { %p518_p2 = pnand %p516_p1, %p513_p0 }
   0x9   :  { %521 = shalt.err (!%p518_p2)
}
   0xa   :  { %s522_s10 = scalar_lea.vmem %s34_s25, 128  ;;  %p527_p4 = scmp.lt.s32.totalorder %s34_s25, %s34_s25 }
   0xb   :  { %p523_p3 = scmp.ne.s32.totalorder %s34_s25, %s522_s10  ;;  %p528_p5 = scmp.lt.s32.totalorder %s522_s10, %s522_s10 }
   0xd   :  { %p529_p6 = por %p528_p5, %p527_p4 }
   0xf   :  { %p530_p7 = pnand %p529_p6, %p523_p3 }
  0x11   :  { %533 = shalt.err (!%p530_p7)
}
  0x12   :  { %s631_s11 = smov 64   ;;  %s632_s12 = smov 4  }
  0x13   :  { %39 = dma.hbm_to_vmem [thread:$0]  %s796_s1, 128, %s34_s25, [#allocation6], %s631_s11, %s631_s11, %s632_s12  }
  0x14   :  { %s633_s15 = smov [#allocation2]   ;;  %s534_s19 = scalar_lea.hbm %s795_s0, 256 }
  0x15   :  { %s21_s16 = sshll.u32 %s633_s15, 4  ;;  %p535_p8 = scmp.ne.s32.totalorder %s795_s0, %s534_s19  ;;  %s22_s16 = int_to_ptr.vmem [resolvable:$true] %s21_s16 }
  0x16   :  { %p538_p9 = scmp.lt.u32.totalorder %s534_s19, %s795_s0 }
  0x18   :  { %p540_p10 = pnand %p538_p9, %p535_p8 }
  0x1a   :  { %543 = shalt.err (!%p540_p10)
}
  0x1b   :  { %s544_s24 = scalar_lea.vmem %s22_s16, 256  ;;  %p549_p12 = scmp.lt.s32.totalorder %s22_s16, %s22_s16 }
  0x1c   :  { %p545_p11 = scmp.ne.s32.totalorder %s22_s16, %s544_s24  ;;  %p550_p13 = scmp.lt.s32.totalorder %s544_s24, %s544_s24 }
  0x1e   :  { %p551_p0 = por %p550_p13, %p549_p12 }
  0x20   :  { %p552_p1 = pnand %p551_p0, %p545_p11 }
  0x22   :  { %555 = shalt.err (!%p552_p1)
}
  0x23   :  { %s634_s1 = smov 128   ;;  %s635_s25 = smov 8  }
  0x24   :  { %27 = dma.hbm_to_vmem [thread:$0]  %s795_s0, 256, %s22_s16, [#allocation3], %s634_s1, %s634_s1, %s635_s25  }
  0x25   :  { %s636_s28 = smov [#allocation7]   ;;  %s637_s30 = smov [#allocation8]  }
  0x26   :  { %s47_s29 = sshll.u32 %s636_s28, 4  ;;  %s61_s8 = sshll.u32 %s637_s30, 4  ;;  %s48_s29 = int_to_ptr.vmem [resolvable:$true] %s47_s29  ;;  %s711_s8 = int_to_ptr.vmem [resolvable:$true] %s61_s8 }
  0x27   :  { %s556_s13 = scalar_lea.hbm %s798_s3, 1024 }
  0x28   :  { %p557_p2 = scmp.ne.s32.totalorder %s798_s3, %s556_s13  ;;  %p560_p3 = scmp.lt.u32.totalorder %s556_s13, %s798_s3 }
  0x2a   :  { %p562_p4 = pnand %p560_p3, %p557_p2 }
  0x2c   :  { %565 = shalt.err (!%p562_p4)
}
  0x2d   :  { %s566_s0 = scalar_lea.vmem %s48_s29, 1024  ;;  %p571_p6 = scmp.lt.s32.totalorder %s48_s29, %s48_s29 }
  0x2e   :  { %p567_p5 = scmp.ne.s32.totalorder %s48_s29, %s566_s0  ;;  %p572_p7 = scmp.lt.s32.totalorder %s566_s0, %s566_s0 }
  0x30   :  { %p573_p8 = por %p572_p7, %p571_p6 }
  0x32   :  { %p574_p9 = pnand %p573_p8, %p567_p5 }
  0x34   :  { %577 = shalt.err (!%p574_p9)
}
  0x35   :  { %53 = dma.hbm_to_vmem [thread:$0]  %s798_s3, 1024, %s48_s29, [#allocation6], %s631_s11, %s631_s11, %s632_s12  }
  0x36   :  { %s578_s22 = scalar_lea.hbm %s800_s5, 1024 }
  0x37   :  { %p579_p10 = scmp.ne.s32.totalorder %s800_s5, %s578_s22  ;;  %p582_p11 = scmp.lt.u32.totalorder %s578_s22, %s800_s5 }
  0x39   :  { %p584_p12 = pnand %p582_p11, %p579_p10 }
  0x3b   :  { %587 = shalt.err (!%p584_p12)
}
  0x3c   :  { %s588_s28 = scalar_lea.vmem %s711_s8, 1024  ;;  %p593_p0 = scmp.lt.s32.totalorder %s711_s8, %s711_s8 }
  0x3d   :  { %p589_p13 = scmp.ne.s32.totalorder %s711_s8, %s588_s28  ;;  %p594_p1 = scmp.lt.s32.totalorder %s588_s28, %s588_s28 }
  0x3f   :  { %p595_p2 = por %p594_p1, %p593_p0 }
  0x41   :  { %p596_p3 = pnand %p595_p2, %p589_p13 }
  0x43   :  { %599 = shalt.err (!%p596_p3)
}
  0x44   :  { %67 = dma.hbm_to_vmem [thread:$0]  %s800_s5, 1024, %s711_s8, [#allocation9], %s631_s11, %s631_s11, %s632_s12  }
  0x45   :  { %622 = dma.done.wait [#allocation3], 256  }
  0x46   :  { %623 = vsyncadd [#allocation3], 4294967040 }
  0x47   :  { %624 = dma.done.wait [#allocation6], 1152  }
  0x48   :  { %625 = vsyncadd [#allocation6], 4294966144 }
  0x49   :  { %626 = dma.done.wait [#allocation9], 1024  }
  0x4a   :  { %627 = vsyncadd [#allocation9], 4294966272  ;;  %v638_v0 = vmov 0.0   ;;  %vm639_vm0 = vmmov 0   ;;  %v495_v1 = vld [vmem:[#allocation5] sm:$0xff]   ;;  %v83_v2 = vld [vmem:[#allocation2] sm:$0xff] }
  0x4b   :  { %438 = vmatprep.subr.bf16.mxu0 %v638_v0  ;;  %440 = vmatprep.mubr.msk.bf16.mxu0 %vm639_vm0, %v638_v0  ;;  %v84_v3 = vld [vmem:[#allocation2 + $0x8] sm:$0xff]  ;;  %vm101_vm1 = vcmask 130048   ;;  %v496_v5 = vld [vmem:[#allocation7] sm:$0xff]   ;;  %v497_v6 = vld [vmem:[#allocation7 + $0x8] sm:$0xff]   ;;  %s640_s9 = smov [#allocation10]  }
  0x4c   :  { %444 = vmatprep.subr.bf16.mxu1 %v638_v0  ;;  %460 = vmatprep.mubr.msk.bf16.mxu1 %vm639_vm0, %v638_v0  ;;  %v85_v4 = vpack.c.bf16 %v84_v3, %v83_v2  ;;  %v498_v7 = vld [vmem:[#allocation7 + $0x10] sm:$0xff]   ;;  %v499_v8 = vld [vmem:[#allocation7 + $0x18] sm:$0xff]   ;;  %v500_v9 = vld [vmem:[#allocation7 + $0x20] sm:$0xff]   ;;  %s383_s10 = sshll.u32 %s640_s9, 4  ;;  %s384_s10 = int_to_ptr.vmem [resolvable:$true] %s383_s10 }
  0x4d   :  { %439 = vmatpush3.bf16.msra.mxu0 %v495_v1  ;;  %445 = vmatpush3.bf16.msra.mxu1 %v496_v5  ;;  %v501_v10 = vld [vmem:[#allocation7 + $0x28] sm:$0xff]   ;;  %v502_v11 = vld [vmem:[#allocation7 + $0x30] sm:$0xff]   ;;  %v503_v12 = vld [vmem:[#allocation7 + $0x38] sm:$0xff]   ;;  %p605_p5 = scmp.lt.s32.totalorder %s384_s10, %s384_s10 }
  0x4e   :  { %464 = vmatprep.subr.bf16.mxu0 %v638_v0  ;;  %446 = vmatprep.subr.bf16.mxu1 %v638_v0  ;;  %v504_v13 = vld [vmem:[#allocation8] sm:$0xff]   ;;  %v505_v14 = vld [vmem:[#allocation8 + $0x8] sm:$0xff]   ;;  %v506_v15 = vld [vmem:[#allocation8 + $0x10] sm:$0xff]  }
  0x4f   :  { %v507_v16 = vld [vmem:[#allocation8 + $0x18] sm:$0xff]   ;;  %v508_v17 = vld [vmem:[#allocation8 + $0x20] sm:$0xff]   ;;  %v509_v18 = vld [vmem:[#allocation8 + $0x28] sm:$0xff]  }
  0x50   :  { %441 = vmatmul.mubr.msk.bf16.vlgmr.msra.gmra.mrb[0].mxu0 %vm101_vm1, %v85_v4  ;;  %v397_v19 = vld [vmem:[%s797_s2] ss:$0 sm:$0xff]  ;;  %v510_v29 = vld [vmem:[#allocation8 + $0x30] sm:$0xff]   ;;  %v511_v30 = vld [vmem:[#allocation8 + $0x38] sm:$0xff]  }
  0x51   :  { %480 = vmatprep.mubr.msk.bf16.mxu0 %vm639_vm0, %v638_v0  ;;  %447 = vmatpush3.bf16.msra.mxu1 %v497_v6  ;;  %v400_v31 = vld [vmem:[%s799_s4] ss:$0 sm:$0xff]  ;;  %s600_s4 = scalar_lea.vmem %s384_s10, 256 }
  0x52   :  { %448 = vmatprep.subr.bf16.mxu1 %v638_v0  ;;  %465 = vmatpush3.bf16.msra.mxu0 %v504_v13  ;;  %v409_v41 = vld [vmem:[%s801_s6] ss:$0 sm:$0xff]  ;;  %p601_p4 = scmp.ne.s32.totalorder %s384_s10, %s600_s4  ;;  %p606_p6 = scmp.lt.s32.totalorder %s600_s4, %s600_s4 }
  0x53   :  { %466 = vmatprep.subr.bf16.mxu0 %v638_v0 }
  0x54   :  { %p607_p7 = por %p606_p6, %p605_p5 }
  0x55   :  { %449 = vmatpush3.bf16.msra.mxu1 %v498_v7 }
  0x56   :  { %450 = vmatprep.subr.bf16.mxu1 %v638_v0  ;;  %467 = vmatpush3.bf16.msra.mxu0 %v505_v14  ;;  %p608_p8 = pnand %p607_p7, %p601_p4 }
  0x57   :  { %468 = vmatprep.subr.bf16.mxu0 %v638_v0 }
  0x59   :  { %451 = vmatpush3.bf16.msra.mxu1 %v499_v8 }
  0x5a   :  { %452 = vmatprep.subr.bf16.mxu1 %v638_v0  ;;  %469 = vmatpush3.bf16.msra.mxu0 %v506_v15 }
  0x5b   :  { %470 = vmatprep.subr.bf16.mxu0 %v638_v0 }
  0x5d   :  { %453 = vmatpush3.bf16.msra.mxu1 %v500_v9 }
  0x5e   :  { %454 = vmatprep.subr.bf16.mxu1 %v638_v0  ;;  %471 = vmatpush3.bf16.msra.mxu0 %v507_v16 }
  0x5f   :  { %472 = vmatprep.subr.bf16.mxu0 %v638_v0 }
  0x61   :  { %455 = vmatpush3.bf16.msra.mxu1 %v501_v10 }
  0x62   :  { %456 = vmatprep.subr.bf16.mxu1 %v638_v0  ;;  %473 = vmatpush3.bf16.msra.mxu0 %v508_v17 }
  0x63   :  { %474 = vmatprep.subr.bf16.mxu0 %v638_v0 }
  0x65   :  { %457 = vmatpush3.bf16.msra.mxu1 %v502_v11 }
  0x66   :  { %458 = vmatprep.subr.bf16.mxu1 %v638_v0  ;;  %475 = vmatpush3.bf16.msra.mxu0 %v509_v18 }
  0x67   :  { %476 = vmatprep.subr.bf16.mxu0 %v638_v0 }
  0x69   :  { %459 = vmatpush3.bf16.msra.mxu1 %v503_v12 }
  0x6a   :  { %477 = vmatpush3.bf16.msra.mxu0 %v510_v29 }
  0x6b   :  { %478 = vmatprep.subr.bf16.mxu0 %v638_v0 }
  0x6e   :  { %479 = vmatpush3.bf16.msra.mxu0 %v511_v30 }
 0x123   :  { %v139_v20 = vpop.f32.mrb[0].mxu0 }
 0x124   :  { %v140_v21 = vadd.f32 %v397_v19, %v139_v20  ;;  %v442_v22 = vpop.f32.mrb[1].mxu0 }
 0x125   :  { %v142_v23 = vpop.f32.mrb[2].mxu0 }
 0x126   :  { %v143_v24 = vadd.f32 %v397_v19, %v142_v23  ;;  %v443_v25 = vpop.f32.mrb[3].mxu0  ;;  %v146_v26 = vmax.f32 %v140_v21, 0.0 }
 0x128   :  { %v147_v27 = vmax.f32 %v143_v24, 0.0 }
 0x12a   :  { %v148_v28 = vpack.c.bf16 %v147_v27, %v146_v26 }
 0x12c   :  { %461 = vmatmul.mubr.bf16.vlgmr.msra.gmra.mrb[0].mxu1 %v148_v28 }
 0x1ff   :  { %v254_v32 = vpop.f32.mrb[0].mxu1 }
 0x200   :  { %v255_v33 = vadd.f32 %v400_v31, %v254_v32  ;;  %v462_v34 = vpop.f32.mrb[1].mxu1 }
 0x201   :  { %v257_v35 = vpop.f32.mrb[2].mxu1 }
 0x202   :  { %v258_v36 = vadd.f32 %v400_v31, %v257_v35  ;;  %v463_v37 = vpop.f32.mrb[3].mxu1  ;;  %v261_v38 = vmax.f32 %v255_v33, 0.0 }
 0x204   :  { %v262_v39 = vmax.f32 %v258_v36, 0.0 }
 0x206   :  { %v263_v40 = vpack.c.bf16 %v262_v39, %v261_v38 }
 0x208   :  { %481 = vmatmul.mubr.bf16.vlgmr.msra.gmra.mrb[4].mxu0 %v263_v40 }
 0x2db   :  { %v369_v42 = vpop.f32.mrb[4].mxu0 }
 0x2dc   :  { %v370_v43 = vadd.f32 %v409_v41, %v369_v42  ;;  %v482_v44 = vpop.f32.mrb[5].mxu0 }
 0x2dd   :  { %v372_v45 = vpop.f32.mrb[6].mxu0 }
 0x2de   :  { %376 = vst [vmem:[#allocation10] sm:$0xff] %v370_v43  ;;  %v373_v46 = vadd.f32 %v409_v41, %v372_v45  ;;  %v483_v47 = vpop.f32.mrb[7].mxu0 }
 0x2e0   :  { %377 = vst [vmem:[#allocation10 + $0x8] sm:$0xff] %v373_v46 }
 0x2e1   :  { %611 = shalt.err (!%p608_p8)
}
 0x2e2   :  { %s612_s14 = scalar_lea.hbm %s802_s7, 256 }
 0x2e3   :  { %p613_p9 = scmp.ne.s32.totalorder %s802_s7, %s612_s14  ;;  %p616_p10 = scmp.lt.u32.totalorder %s612_s14, %s802_s7 }
 0x2e5   :  { %p618_p11 = pnand %p616_p10, %p613_p9 }
 0x2e7   :  { %621 = shalt.err (!%p618_p11)
}
 0x2e8   :  { %389 = dma.vmem_to_hbm [thread:$0]  %s384_s10, 256, %s802_s7, [#allocation4], %s634_s1, %s634_s1, %s635_s25  }
 0x2e9   :  { %628 = dma.done.wait [#allocation4], 256  }
 0x2ea   :  { %629 = vsyncadd [#allocation4], 4294967040 }
 0x2eb   :  { %393 = vsyncpa [#allocation3], 1 }
 0x2ec   :  { %394 = vsyncpa [#allocation6], 1 }
 0x2ed   :  { %395 = vsyncpa [#allocation9], 1 }
 0x2ee   :  { %396 = vsyncpa [#allocation4], 1 }

</bundles_post_ra>
